<compile_context>
chip_gen: v7x
topology: tpu7x:2x2x1
jax: 0.10.0
libtpu: 0.0.40
codegen_flags: <defaults>
</compile_context>

<pallas_src>
import jax
import jax.numpy as jnp
from jax.experimental import pallas as pl
from jax.experimental.pallas import tpu as pltpu

EMBED_SIZE = 10
NUM_HIDDEN = 256
VOCAB = 417
VOCAB_PAD = 512           # pad one-hot vocab axis to a multiple of 128
X_FEATURES = 15
OUT_PAD = 128             # lane-dense padded output width


def _ship_mlp_kernel(ids_ref, x_ref,
                     we1_ref, wx1_ref, b1_ref,
                     w2_ref, b2_ref,
                     w3_ref, b3_ref,
                     w4_ref, b4_ref,
                     w5_ref, b5_ref,
                     o_ref):
    """One batch tile of the fused embedding + MLP forward.

    ids_ref: (TB, 1) int32     x_ref: (TB, 15) f32     o_ref: (TB, 128) f32
    we1_ref: (512, 256) bf16  == zero-padded (embed_table @ W1[:10])
    wx1_ref: (15, 256)  bf16  == W1[10:25]
    w5_ref : (64, 128)  bf16  == W5 zero-padded on the output (lane) dim
    Biases are f32 (1, N).
    """
    tb = ids_ref.shape[0]

    # Fused embedding gather: one-hot(ship_id) @ (table @ W1_emb)  -> (TB, 256)
    ids = ids_ref[...]                                              # (TB, 1)
    lane = jax.lax.broadcasted_iota(jnp.int32, (tb, VOCAB_PAD), 1)  # (TB, 512)
    one_hot = jnp.where(lane == ids, 1.0, 0.0).astype(jnp.bfloat16)

    h = jnp.dot(one_hot, we1_ref[...], preferred_element_type=jnp.float32)
    h = h + jnp.dot(x_ref[...].astype(jnp.bfloat16), wx1_ref[...],
                    preferred_element_type=jnp.float32)
    h = jnp.maximum(h + b1_ref[...], 0.0)                           # 25 -> 256

    h = jnp.dot(h.astype(jnp.bfloat16), w2_ref[...],
                preferred_element_type=jnp.float32)
    h = jnp.maximum(h + b2_ref[...], 0.0)                           # 256 -> 256

    h = jnp.dot(h.astype(jnp.bfloat16), w3_ref[...],
                preferred_element_type=jnp.float32)
    h = jnp.maximum(h + b3_ref[...], 0.0)                           # 256 -> 128

    h = jnp.dot(h.astype(jnp.bfloat16), w4_ref[...],
                preferred_element_type=jnp.float32)
    h = jnp.maximum(h + b4_ref[...], 0.0)                           # 128 -> 64

    h = jnp.dot(h.astype(jnp.bfloat16), w5_ref[...],
                preferred_element_type=jnp.float32)                 # 64 -> 128 (padded)
    o_ref[...] = h + b5_ref[...]                                    # lane-dense store


def ship_forward(x, ship_id, params, tb=1024):
    """x: (B, 15) float32, ship_id: (B, 1) int32. Returns (B, 1) float32."""
    B = x.shape[0]
    tb = min(tb, B)
    nb = pl.cdiv(B, tb)
    Bp = nb * tb
    if Bp != B:                      # pad batch so the grid tiles it evenly
        x = jnp.pad(x, ((0, Bp - B), (0, 0)))
        ship_id = jnp.pad(ship_id, ((0, Bp - B), (0, 0)))   # index 0 is valid

    # --- weight prep (tiny, weight-only ops; fused/constant-folded under jit) ---
    w1 = params["w1"]                                        # (25, 256) f32
    we1 = jnp.zeros((VOCAB_PAD, NUM_HIDDEN), jnp.float32)
    we1 = we1.at[:VOCAB].set(params["embed"] @ w1[:EMBED_SIZE])
    we1 = we1.astype(jnp.bfloat16)                           # (512, 256) bf16
    wx1 = w1[EMBED_SIZE:].astype(jnp.bfloat16)               # (15, 256)  bf16
    w2 = params["w2"].astype(jnp.bfloat16)                   # (256, 256)
    w3 = params["w3"].astype(jnp.bfloat16)                   # (256, 128)
    w4 = params["w4"].astype(jnp.bfloat16)                   # (128, 64)
    w5p = jnp.zeros((NUM_HIDDEN // 4, OUT_PAD), jnp.float32)
    w5p = w5p.at[:, :1].set(params["w5"]).astype(jnp.bfloat16)   # (64, 128)
    b5p = jnp.zeros((1, OUT_PAD), jnp.float32).at[:, :1].set(params["b5"])
    b1, b2, b3, b4 = params["b1"], params["b2"], params["b3"], params["b4"]

    batch_map = lambda i: (i, 0)
    const_map = lambda i: (0, 0)     # weights DMA'd once, stay VMEM-resident

    weights = [we1, wx1, b1, w2, b2, w3, b3, w4, b4, w5p, b5p]
    in_specs = [pl.BlockSpec((tb, 1), batch_map),            # ship_id
                pl.BlockSpec((tb, X_FEATURES), batch_map)]   # x
    in_specs += [pl.BlockSpec(w.shape, const_map) for w in weights]
    out_specs = pl.BlockSpec((tb, OUT_PAD), batch_map)

    macs_per_row = (VOCAB_PAD * 256 + X_FEATURES * 256 + 256 * 256
                    + 256 * 128 + 128 * 64 + 64 * OUT_PAD)
    weight_bytes = sum(int(w.size) * w.dtype.itemsize for w in weights)
    cost = pl.CostEstimate(
        flops=2 * Bp * macs_per_row,
        transcendentals=0,
        bytes_accessed=Bp * (X_FEATURES * 4 + 4 + OUT_PAD * 4) + weight_bytes)

    out = pl.pallas_call(
        _ship_mlp_kernel,
        out_shape=jax.ShapeDtypeStruct((Bp, OUT_PAD), jnp.float32),
        grid=(nb,),
        in_specs=in_specs,
        out_specs=out_specs,
        compiler_params=pltpu.CompilerParams(
            dimension_semantics=("parallel",),
            vmem_limit_bytes=32 * 1024 * 1024),
        cost_estimate=cost,
    )(ship_id, x, *weights)

    return out[:B, :1]


def init_params(key):
    """Deterministic init matching the PyTorch module's parameter shapes.

    nn.Linear stores (out, in); we store the transposed (in, out) layout so the
    kernel does x @ W directly.  Biases stored as (1, out).
    """
    def linear(key, fan_in, fan_out):
        kw, kb = jax.random.split(key)
        bound = 1.0 / jnp.sqrt(jnp.float32(fan_in))
        w = jax.random.uniform(kw, (fan_in, fan_out), jnp.float32, -bound, bound)
        b = jax.random.uniform(kb, (1, fan_out), jnp.float32, -bound, bound)
        return w, b

    keys = jax.random.split(key, 6)
    embed = jax.random.normal(keys[0], (VOCAB, EMBED_SIZE), jnp.float32)
    w1, b1 = linear(keys[1], EMBED_SIZE + X_FEATURES, NUM_HIDDEN)   # 25 -> 256
    w2, b2 = linear(keys[2], NUM_HIDDEN, NUM_HIDDEN)                # 256 -> 256
    w3, b3 = linear(keys[3], NUM_HIDDEN, NUM_HIDDEN // 2)           # 256 -> 128
    w4, b4 = linear(keys[4], NUM_HIDDEN // 2, NUM_HIDDEN // 4)      # 128 -> 64
    w5, b5 = linear(keys[5], NUM_HIDDEN // 4, 1)                    # 64 -> 1
    return dict(embed=embed,
                w1=w1, b1=b1, w2=w2, b2=b2, w3=w3, b3=b3,
                w4=w4, b4=b4, w5=w5, b5=b5)


def _reference_forward(x, ship_id, params):
    """Pure-JAX f32 reference matching the PyTorch module exactly."""
    emb = jnp.take(params["embed"], ship_id[:, 0], axis=0)
    h = jnp.concatenate([emb, x], axis=1)
    h = jnp.maximum(h @ params["w1"] + params["b1"], 0.0)
    h = jnp.maximum(h @ params["w2"] + params["b2"], 0.0)
    h = jnp.maximum(h @ params["w3"] + params["b3"], 0.0)
    h = jnp.maximum(h @ params["w4"] + params["b4"], 0.0)
    return h @ params["w5"] + params["b5"]


if __name__ == "__main__":
    key = jax.random.PRNGKey(0)
    kp, kx, kid = jax.random.split(key, 3)

    B = 8
    params = init_params(kp)
    x = jax.random.normal(kx, (B, X_FEATURES), jnp.float32)
    ship_id = jax.random.randint(kid, (B, 1), 0, VOCAB, jnp.int32)

    out = ship_forward(x, ship_id, params)
    out = jax.block_until_ready(out)

    ref = _reference_forward(x, ship_id, params)
    assert out.shape == (B, 1)
    # bf16 weights/activations in the kernel vs f32 reference -> looser tolerance.
    assert jnp.allclose(out, ref, atol=5e-2, rtol=5e-2), "mismatch vs reference"
    print("KERNEL_OK")
</pallas_src>

<mosaic_0001>
module attributes {stable_mosaic.version = 11 : i64} {
  func.func @_ship_mlp_kernel(%arg0: i32, %arg1: memref<8x1xi32, #tpu.memory_space<vmem>>, %arg2: memref<8x15xf32, #tpu.memory_space<vmem>>, %arg3: memref<512x256xbf16, #tpu.memory_space<vmem>>, %arg4: memref<15x256xbf16, #tpu.memory_space<vmem>>, %arg5: memref<1x256xf32, #tpu.memory_space<vmem>>, %arg6: memref<256x256xbf16, #tpu.memory_space<vmem>>, %arg7: memref<1x256xf32, #tpu.memory_space<vmem>>, %arg8: memref<256x128xbf16, #tpu.memory_space<vmem>>, %arg9: memref<1x128xf32, #tpu.memory_space<vmem>>, %arg10: memref<128x64xbf16, #tpu.memory_space<vmem>>, %arg11: memref<1x64xf32, #tpu.memory_space<vmem>>, %arg12: memref<64x128xbf16, #tpu.memory_space<vmem>>, %arg13: memref<1x128xf32, #tpu.memory_space<vmem>>, %arg14: memref<8x128xf32, #tpu.memory_space<vmem>>) attributes {dimension_semantics = [#tpu.dimension_semantics<parallel>], iteration_bounds = array<i64: 1>, scalar_prefetch = 0 : i64, scratch_operands = 0 : i64, tpu.core_type = #tpu.core_type<tc>, window_params = [{transform_indices = @transform_0, window_bounds = array<i64: 8, 1>}, {transform_indices = @transform_1, window_bounds = array<i64: 8, 15>}, {pipeline_mode = #tpu.pipeline_mode<synchronous>, transform_indices = @transform_2, window_bounds = array<i64: 512, 256>}, {pipeline_mode = #tpu.pipeline_mode<synchronous>, transform_indices = @transform_3, window_bounds = array<i64: 15, 256>}, {pipeline_mode = #tpu.pipeline_mode<synchronous>, transform_indices = @transform_4, window_bounds = array<i64: 1, 256>}, {pipeline_mode = #tpu.pipeline_mode<synchronous>, transform_indices = @transform_5, window_bounds = array<i64: 256, 256>}, {pipeline_mode = #tpu.pipeline_mode<synchronous>, transform_indices = @transform_6, window_bounds = array<i64: 1, 256>}, {pipeline_mode = #tpu.pipeline_mode<synchronous>, transform_indices = @transform_7, window_bounds = array<i64: 256, 128>}, {pipeline_mode = #tpu.pipeline_mode<synchronous>, transform_indices = @transform_8, window_bounds = array<i64: 1, 128>}, {pipeline_mode = #tpu.pipeline_mode<synchronous>, transform_indices = @transform_9, window_bounds = array<i64: 128, 64>}, {pipeline_mode = #tpu.pipeline_mode<synchronous>, transform_indices = @transform_10, window_bounds = array<i64: 1, 64>}, {pipeline_mode = #tpu.pipeline_mode<synchronous>, transform_indices = @transform_11, window_bounds = array<i64: 64, 128>}, {pipeline_mode = #tpu.pipeline_mode<synchronous>, transform_indices = @transform_12, window_bounds = array<i64: 1, 128>}, {transform_indices = @transform_13, window_bounds = array<i64: 8, 128>}]} {
    %c0 = arith.constant 0 : index
    %c0_0 = arith.constant 0 : index
    %0 = vector.load %arg1[%c0, %c0_0] : memref<8x1xi32, #tpu.memory_space<vmem>>, vector<8x1xi32>
    %1 = tpu.iota {dimensions = array<i32: 1>} : vector<8x512xi32>
    %2 = vector.broadcast %0 : vector<8x1xi32> to vector<8x512xi32>
    %3 = arith.cmpi eq, %1, %2 : vector<8x512xi32>
    %cst = arith.constant 1.000000e+00 : f32
    %cst_1 = arith.constant 0.000000e+00 : f32
    %4 = vector.broadcast %cst : f32 to vector<8x512xf32>
    %5 = vector.broadcast %cst_1 : f32 to vector<8x512xf32>
    %6 = arith.select %3, %4, %5 : vector<8x512xi1>, vector<8x512xf32>
    %7 = arith.truncf %6 : vector<8x512xf32> to vector<8x512xbf16>
    %c0_2 = arith.constant 0 : index
    %c0_3 = arith.constant 0 : index
    %8 = vector.load %arg3[%c0_2, %c0_3] : memref<512x256xbf16, #tpu.memory_space<vmem>>, vector<512x256xbf16>
    %cst_4 = arith.constant dense<0.000000e+00> : vector<8x256xf32>
    %9 = tpu.matmul %7, %8, %cst_4 {dimension_numbers = #tpu.dot_dimension_numbers<[1], [0], [0], [1], [0, 0, 1, 1], [], []>} : vector<8x512xbf16>, vector<512x256xbf16>, vector<8x256xf32> -> vector<8x256xf32>
    %c0_5 = arith.constant 0 : index
    %c0_6 = arith.constant 0 : index
    %10 = vector.load %arg2[%c0_5, %c0_6] : memref<8x15xf32, #tpu.memory_space<vmem>>, vector<8x15xf32>
    %11 = arith.truncf %10 : vector<8x15xf32> to vector<8x15xbf16>
    %c0_7 = arith.constant 0 : index
    %c0_8 = arith.constant 0 : index
    %12 = vector.load %arg4[%c0_7, %c0_8] : memref<15x256xbf16, #tpu.memory_space<vmem>>, vector<15x256xbf16>
    %cst_9 = arith.constant dense<0.000000e+00> : vector<8x256xf32>
    %13 = tpu.matmul %11, %12, %cst_9 {dimension_numbers = #tpu.dot_dimension_numbers<[1], [0], [0], [1], [0, 0, 1, 1], [], []>} : vector<8x15xbf16>, vector<15x256xbf16>, vector<8x256xf32> -> vector<8x256xf32>
    %14 = arith.addf %9, %13 : vector<8x256xf32>
    %c0_10 = arith.constant 0 : index
    %c0_11 = arith.constant 0 : index
    %15 = vector.load %arg5[%c0_10, %c0_11] : memref<1x256xf32, #tpu.memory_space<vmem>>, vector<1x256xf32>
    %16 = vector.broadcast %15 : vector<1x256xf32> to vector<8x256xf32>
    %17 = arith.addf %14, %16 : vector<8x256xf32>
    %cst_12 = arith.constant 0.000000e+00 : f32
    %18 = vector.broadcast %cst_12 : f32 to vector<8x256xf32>
    %19 = arith.maximumf %17, %18 : vector<8x256xf32>
    %20 = arith.truncf %19 : vector<8x256xf32> to vector<8x256xbf16>
    %c0_13 = arith.constant 0 : index
    %c0_14 = arith.constant 0 : index
    %21 = vector.load %arg6[%c0_13, %c0_14] : memref<256x256xbf16, #tpu.memory_space<vmem>>, vector<256x256xbf16>
    %cst_15 = arith.constant dense<0.000000e+00> : vector<8x256xf32>
    %22 = tpu.matmul %20, %21, %cst_15 {dimension_numbers = #tpu.dot_dimension_numbers<[1], [0], [0], [1], [0, 0, 1, 1], [], []>} : vector<8x256xbf16>, vector<256x256xbf16>, vector<8x256xf32> -> vector<8x256xf32>
    %c0_16 = arith.constant 0 : index
    %c0_17 = arith.constant 0 : index
    %23 = vector.load %arg7[%c0_16, %c0_17] : memref<1x256xf32, #tpu.memory_space<vmem>>, vector<1x256xf32>
    %24 = vector.broadcast %23 : vector<1x256xf32> to vector<8x256xf32>
    %25 = arith.addf %22, %24 : vector<8x256xf32>
    %cst_18 = arith.constant 0.000000e+00 : f32
    %26 = vector.broadcast %cst_18 : f32 to vector<8x256xf32>
    %27 = arith.maximumf %25, %26 : vector<8x256xf32>
    %28 = arith.truncf %27 : vector<8x256xf32> to vector<8x256xbf16>
    %c0_19 = arith.constant 0 : index
    %c0_20 = arith.constant 0 : index
    %29 = vector.load %arg8[%c0_19, %c0_20] : memref<256x128xbf16, #tpu.memory_space<vmem>>, vector<256x128xbf16>
    %cst_21 = arith.constant dense<0.000000e+00> : vector<8x128xf32>
    %30 = tpu.matmul %28, %29, %cst_21 {dimension_numbers = #tpu.dot_dimension_numbers<[1], [0], [0], [1], [0, 0, 1, 1], [], []>} : vector<8x256xbf16>, vector<256x128xbf16>, vector<8x128xf32> -> vector<8x128xf32>
    %c0_22 = arith.constant 0 : index
    %c0_23 = arith.constant 0 : index
    %31 = vector.load %arg9[%c0_22, %c0_23] : memref<1x128xf32, #tpu.memory_space<vmem>>, vector<1x128xf32>
    %32 = vector.broadcast %31 : vector<1x128xf32> to vector<8x128xf32>
    %33 = arith.addf %30, %32 : vector<8x128xf32>
    %cst_24 = arith.constant 0.000000e+00 : f32
    %34 = vector.broadcast %cst_24 : f32 to vector<8x128xf32>
    %35 = arith.maximumf %33, %34 : vector<8x128xf32>
    %36 = arith.truncf %35 : vector<8x128xf32> to vector<8x128xbf16>
    %c0_25 = arith.constant 0 : index
    %c0_26 = arith.constant 0 : index
    %37 = vector.load %arg10[%c0_25, %c0_26] : memref<128x64xbf16, #tpu.memory_space<vmem>>, vector<128x64xbf16>
    %cst_27 = arith.constant dense<0.000000e+00> : vector<8x64xf32>
    %38 = tpu.matmul %36, %37, %cst_27 {dimension_numbers = #tpu.dot_dimension_numbers<[1], [0], [0], [1], [0, 0, 1, 1], [], []>} : vector<8x128xbf16>, vector<128x64xbf16>, vector<8x64xf32> -> vector<8x64xf32>
    %c0_28 = arith.constant 0 : index
    %c0_29 = arith.constant 0 : index
    %39 = vector.load %arg11[%c0_28, %c0_29] : memref<1x64xf32, #tpu.memory_space<vmem>>, vector<1x64xf32>
    %40 = vector.broadcast %39 : vector<1x64xf32> to vector<8x64xf32>
    %41 = arith.addf %38, %40 : vector<8x64xf32>
    %cst_30 = arith.constant 0.000000e+00 : f32
    %42 = vector.broadcast %cst_30 : f32 to vector<8x64xf32>
    %43 = arith.maximumf %41, %42 : vector<8x64xf32>
    %44 = arith.truncf %43 : vector<8x64xf32> to vector<8x64xbf16>
    %c0_31 = arith.constant 0 : index
    %c0_32 = arith.constant 0 : index
    %45 = vector.load %arg12[%c0_31, %c0_32] : memref<64x128xbf16, #tpu.memory_space<vmem>>, vector<64x128xbf16>
    %cst_33 = arith.constant dense<0.000000e+00> : vector<8x128xf32>
    %46 = tpu.matmul %44, %45, %cst_33 {dimension_numbers = #tpu.dot_dimension_numbers<[1], [0], [0], [1], [0, 0, 1, 1], [], []>} : vector<8x64xbf16>, vector<64x128xbf16>, vector<8x128xf32> -> vector<8x128xf32>
    %c0_34 = arith.constant 0 : index
    %c0_35 = arith.constant 0 : index
    %47 = vector.load %arg13[%c0_34, %c0_35] : memref<1x128xf32, #tpu.memory_space<vmem>>, vector<1x128xf32>
    %48 = vector.broadcast %47 : vector<1x128xf32> to vector<8x128xf32>
    %49 = arith.addf %46, %48 : vector<8x128xf32>
    %c0_36 = arith.constant 0 : index
    %c0_37 = arith.constant 0 : index
    %50 = vector.load %arg14[%c0_36, %c0_37] : memref<8x128xf32, #tpu.memory_space<vmem>>, vector<8x128xf32>
    tpu.vector_store %arg14[%c0_36, %c0_37], %49 {strides = array<i32>} : memref<8x128xf32, #tpu.memory_space<vmem>>, vector<8x128xf32>,
    return
  }
  func.func @transform_0(%arg0: i32) -> (i32, i32) {
    %c0_i32 = arith.constant 0 : i32
    %c0_i32_0 = arith.constant 0 : i32
    return %arg0, %c0_i32 : i32, i32
  }
  func.func @transform_1(%arg0: i32) -> (i32, i32) {
    %c0_i32 = arith.constant 0 : i32
    %c0_i32_0 = arith.constant 0 : i32
    return %arg0, %c0_i32 : i32, i32
  }
  func.func @transform_2(%arg0: i32) -> (i32, i32) {
    %c0_i32 = arith.constant 0 : i32
    %c0_i32_0 = arith.constant 0 : i32
    %c0_i32_1 = arith.constant 0 : i32
    return %c0_i32, %c0_i32_0 : i32, i32
  }
  func.func @transform_3(%arg0: i32) -> (i32, i32) {
    %c0_i32 = arith.constant 0 : i32
    %c0_i32_0 = arith.constant 0 : i32
    %c0_i32_1 = arith.constant 0 : i32
    return %c0_i32, %c0_i32_0 : i32, i32
  }
  func.func @transform_4(%arg0: i32) -> (i32, i32) {
    %c0_i32 = arith.constant 0 : i32
    %c0_i32_0 = arith.constant 0 : i32
    %c0_i32_1 = arith.constant 0 : i32
    return %c0_i32, %c0_i32_0 : i32, i32
  }
  func.func @transform_5(%arg0: i32) -> (i32, i32) {
    %c0_i32 = arith.constant 0 : i32
    %c0_i32_0 = arith.constant 0 : i32
    %c0_i32_1 = arith.constant 0 : i32
    return %c0_i32, %c0_i32_0 : i32, i32
  }
  func.func @transform_6(%arg0: i32) -> (i32, i32) {
    %c0_i32 = arith.constant 0 : i32
    %c0_i32_0 = arith.constant 0 : i32
    %c0_i32_1 = arith.constant 0 : i32
    return %c0_i32, %c0_i32_0 : i32, i32
  }
  func.func @transform_7(%arg0: i32) -> (i32, i32) {
    %c0_i32 = arith.constant 0 : i32
    %c0_i32_0 = arith.constant 0 : i32
    %c0_i32_1 = arith.constant 0 : i32
    return %c0_i32, %c0_i32_0 : i32, i32
  }
  func.func @transform_8(%arg0: i32) -> (i32, i32) {
    %c0_i32 = arith.constant 0 : i32
    %c0_i32_0 = arith.constant 0 : i32
    %c0_i32_1 = arith.constant 0 : i32
    return %c0_i32, %c0_i32_0 : i32, i32
  }
  func.func @transform_9(%arg0: i32) -> (i32, i32) {
    %c0_i32 = arith.constant 0 : i32
    %c0_i32_0 = arith.constant 0 : i32
    %c0_i32_1 = arith.constant 0 : i32
    return %c0_i32, %c0_i32_0 : i32, i32
  }
  func.func @transform_10(%arg0: i32) -> (i32, i32) {
    %c0_i32 = arith.constant 0 : i32
    %c0_i32_0 = arith.constant 0 : i32
    %c0_i32_1 = arith.constant 0 : i32
    return %c0_i32, %c0_i32_0 : i32, i32
  }
  func.func @transform_11(%arg0: i32) -> (i32, i32) {
    %c0_i32 = arith.constant 0 : i32
    %c0_i32_0 = arith.constant 0 : i32
    %c0_i32_1 = arith.constant 0 : i32
    return %c0_i32, %c0_i32_0 : i32, i32
  }
  func.func @transform_12(%arg0: i32) -> (i32, i32) {
    %c0_i32 = arith.constant 0 : i32
    %c0_i32_0 = arith.constant 0 : i32
    %c0_i32_1 = arith.constant 0 : i32
    return %c0_i32, %c0_i32_0 : i32, i32
  }
  func.func @transform_13(%arg0: i32) -> (i32, i32) {
    %c0_i32 = arith.constant 0 : i32
    %c0_i32_0 = arith.constant 0 : i32
    return %arg0, %c0_i32 : i32, i32
  }
}

</mosaic_0001>

<bundles_post_ra>
// kernel: tpu_custom_call.1
= control target key start
LH: loop header
LB: loop body
LE: loop exit
PB: predicated region body
PF: predicated region fallthrough
CT: control target
= control target key end

     0   :  { %18 = vsyncpa [#allocation3], 0  ;;  %s2168_s0 = inlined_call_operand.vmem [shape: s32[8,1], index: 0, kind: input, shape index: {}]   ;;  %s2169_s1 = inlined_call_operand.hbm [shape: f32[8,15], index: 1, kind: input, shape index: {}]   ;;  %s2170_s2 = inlined_call_operand.hbm [shape: bf16[512,256], index: 2, kind: input, shape index: {}]   ;;  %s2171_s3 = inlined_call_operand.hbm [shape: bf16[15,256], index: 3, kind: input, shape index: {}]   ;;  %s2172_s4 = inlined_call_operand.vmem [shape: f32[1,256], index: 4, kind: input, shape index: {}]   ;;  %s2173_s5 = inlined_call_operand.hbm [shape: bf16[256,256], index: 5, kind: input, shape index: {}]   ;;  %s2174_s6 = inlined_call_operand.hbm [shape: f32[1,256], index: 6, kind: input, shape index: {}]   ;;  %s2175_s7 = inlined_call_operand.vmem [shape: bf16[256,128], index: 7, kind: input, shape index: {}]   ;;  %s2176_s8 = inlined_call_operand.vmem [shape: f32[1,128], index: 8, kind: input, shape index: {}]   ;;  %s2177_s9 = inlined_call_operand.vmem [shape: bf16[128,64], index: 9, kind: input, shape index: {}]   ;;  %s2178_s10 = inlined_call_operand.vmem [shape: f32[1,64], index: 10, kind: input, shape index: {}]   ;;  %s2179_s11 = inlined_call_operand.hbm [shape: bf16[64,128], index: 11, kind: input, shape index: {}]   ;;  %s2180_s12 = inlined_call_operand.vmem [shape: f32[1,128], index: 12, kind: input, shape index: {}]   ;;  %s2181_s13 = inlined_call_operand.hbm [shape: f32[8,128], index: 13, kind: output, shape index: {}]  }
   0x1   :  { %19 = vsyncpa [#allocation6], 0 }
   0x2   :  { %20 = vsyncpa [#allocation9], 0 }
   0x3   :  { %21 = vsyncpa [#allocation12], 0 }
   0x4   :  { %22 = vsyncpa [#allocation4], 0  ;;  %s1900_s25 = smov [#allocation5]   ;;  %s1736_s29 = scalar_lea.hbm %s2170_s2, 8192 }
   0x5   :  { %s40_s26 = sshll.u32 %s1900_s25, 4  ;;  %p1737_p0 = scmp.ne.s32.totalorder %s2170_s2, %s1736_s29  ;;  %s41_s26 = int_to_ptr.vmem [resolvable:$true] %s40_s26 }
   0x6   :  { %p1740_p1 = scmp.lt.u32.totalorder %s1736_s29, %s2170_s2 }
   0x8   :  { %p1742_p2 = pnand %p1740_p1, %p1737_p0 }
   0xa   :  { %1745 = shalt.err (!%p1742_p2)
}
   0xb   :  { %s1746_s17 = scalar_lea.vmem %s41_s26, 8192  ;;  %p1751_p4 = scmp.lt.s32.totalorder %s41_s26, %s41_s26 }
   0xc   :  { %p1747_p3 = scmp.ne.s32.totalorder %s41_s26, %s1746_s17  ;;  %p1752_p5 = scmp.lt.s32.totalorder %s1746_s17, %s1746_s17 }
   0xe   :  { %p1753_p6 = por %p1752_p5, %p1751_p4 }
  0x10   :  { %p1754_p7 = pnand %p1753_p6, %p1747_p3 }
  0x12   :  { %1757 = shalt.err (!%p1754_p7)
}
  0x13   :  { %s1901_s18 = smov 128   ;;  %s1902_s19 = smov 8  }
  0x14   :  { %46 = dma.hbm_to_vmem [thread:$0]  %s2170_s2, 8192, %s41_s26, [#allocation6], %s1901_s18, %s1901_s18, %s1902_s19  }
  0x15   :  { %s1903_s22 = smov [#allocation8]   ;;  %s1904_s24 = smov [#allocation2]  }
  0x16   :  { %s66_s23 = sshll.u32 %s1903_s22, 4  ;;  %s31_s25 = sshll.u32 %s1904_s24, 4  ;;  %s67_s23 = int_to_ptr.vmem [resolvable:$true] %s66_s23  ;;  %s32_s25 = int_to_ptr.vmem [resolvable:$true] %s31_s25 }
  0x17   :  { %s1758_s29 = scalar_lea.hbm %s2173_s5, 4096 }
  0x18   :  { %p1759_p8 = scmp.ne.s32.totalorder %s2173_s5, %s1758_s29  ;;  %p1762_p9 = scmp.lt.u32.totalorder %s1758_s29, %s2173_s5 }
  0x1a   :  { %p1764_p10 = pnand %p1762_p9, %p1759_p8 }
  0x1c   :  { %1767 = shalt.err (!%p1764_p10)
}
  0x1d   :  { %s1768_s2 = scalar_lea.vmem %s67_s23, 4096  ;;  %p1773_p12 = scmp.lt.s32.totalorder %s67_s23, %s67_s23 }
  0x1e   :  { %p1769_p11 = scmp.ne.s32.totalorder %s67_s23, %s1768_s2  ;;  %p1774_p13 = scmp.lt.s32.totalorder %s1768_s2, %s1768_s2 }
  0x20   :  { %p1775_p0 = por %p1774_p13, %p1773_p12 }
  0x22   :  { %p1776_p1 = pnand %p1775_p0, %p1769_p11 }
  0x24   :  { %1779 = shalt.err (!%p1776_p1)
}
  0x25   :  { %72 = dma.hbm_to_vmem [thread:$0]  %s2173_s5, 4096, %s67_s23, [#allocation9], %s1901_s18, %s1901_s18, %s1902_s19  }
  0x26   :  { %s1780_s22 = scalar_lea.hbm %s2169_s1, 128 }
  0x27   :  { %p1781_p2 = scmp.ne.s32.totalorder %s2169_s1, %s1780_s22  ;;  %p1784_p3 = scmp.lt.u32.totalorder %s1780_s22, %s2169_s1 }
  0x29   :  { %p1786_p4 = pnand %p1784_p3, %p1781_p2 }
  0x2b   :  { %1789 = shalt.err (!%p1786_p4)
}
  0x2c   :  { %s1790_s30 = scalar_lea.vmem %s32_s25, 128  ;;  %p1795_p6 = scmp.lt.s32.totalorder %s32_s25, %s32_s25 }
  0x2d   :  { %p1791_p5 = scmp.ne.s32.totalorder %s32_s25, %s1790_s30  ;;  %p1796_p7 = scmp.lt.s32.totalorder %s1790_s30, %s1790_s30 }
  0x2f   :  { %p1797_p8 = por %p1796_p7, %p1795_p6 }
  0x31   :  { %p1798_p9 = pnand %p1797_p8, %p1791_p5 }
  0x33   :  { %1801 = shalt.err (!%p1798_p9)
}
  0x34   :  { %34 = dma.hbm_to_vmem [thread:$0]  %s2169_s1, 128, %s32_s25, [#allocation3]  }
  0x35   :  { %s1905_s14 = smov [#allocation7]   ;;  %s1906_s16 = smov [#allocation10]  }
  0x36   :  { %s52_s15 = sshll.u32 %s1905_s14, 4  ;;  %s79_s2 = sshll.u32 %s1906_s16, 4  ;;  %s53_s15 = int_to_ptr.vmem [resolvable:$true] %s52_s15  ;;  %s80_s2 = int_to_ptr.vmem [resolvable:$true] %s79_s2 }
  0x37   :  { %s1802_s20 = scalar_lea.hbm %s2171_s3, 256 }
  0x38   :  { %p1803_p10 = scmp.ne.s32.totalorder %s2171_s3, %s1802_s20  ;;  %p1806_p11 = scmp.lt.u32.totalorder %s1802_s20, %s2171_s3 }
  0x3a   :  { %p1808_p12 = pnand %p1806_p11, %p1803_p10 }
  0x3c   :  { %1811 = shalt.err (!%p1808_p12)
}
  0x3d   :  { %s1812_s1 = scalar_lea.vmem %s53_s15, 256  ;;  %p1817_p0 = scmp.lt.s32.totalorder %s53_s15, %s53_s15 }
  0x3e   :  { %p1813_p13 = scmp.ne.s32.totalorder %s53_s15, %s1812_s1  ;;  %p1818_p1 = scmp.lt.s32.totalorder %s1812_s1, %s1812_s1 }
  0x40   :  { %p1819_p2 = por %p1818_p1, %p1817_p0 }
  0x42   :  { %p1820_p3 = pnand %p1819_p2, %p1813_p13 }
  0x44   :  { %1823 = shalt.err (!%p1820_p3)
}
  0x45   :  { %58 = dma.hbm_to_vmem [thread:$0]  %s2171_s3, 256, %s53_s15, [#allocation6], %s1901_s18, %s1901_s18, %s1902_s19  }
  0x46   :  { %s1824_s5 = scalar_lea.hbm %s2174_s6, 32 }
  0x47   :  { %p1825_p4 = scmp.ne.s32.totalorder %s2174_s6, %s1824_s5  ;;  %p1828_p5 = scmp.lt.u32.totalorder %s1824_s5, %s2174_s6 }
  0x49   :  { %p1830_p6 = pnand %p1828_p5, %p1825_p4 }
  0x4b   :  { %1833 = shalt.err (!%p1830_p6)
}
  0x4c   :  { %s1834_s17 = scalar_lea.vmem %s80_s2, 32  ;;  %p1839_p8 = scmp.lt.s32.totalorder %s80_s2, %s80_s2 }
  0x4d   :  { %p1835_p7 = scmp.ne.s32.totalorder %s80_s2, %s1834_s17  ;;  %p1840_p9 = scmp.lt.s32.totalorder %s1834_s17, %s1834_s17 }
  0x4f   :  { %p1841_p10 = por %p1840_p9, %p1839_p8 }
  0x51   :  { %p1842_p11 = pnand %p1841_p10, %p1835_p7 }
  0x53   :  { %1845 = shalt.err (!%p1842_p11)
}
  0x54   :  { %82 = dma.hbm_to_vmem [thread:$0]  %s2174_s6, 32, %s80_s2, [#allocation9]  }
  0x55   :  { %s1907_s19 = smov [#allocation11]   ;;  %s1846_s22 = scalar_lea.hbm %s2179_s11, 512 }
  0x56   :  { %s96_s15 = sshll.u32 %s1907_s19, 4  ;;  %p1847_p12 = scmp.ne.s32.totalorder %s2179_s11, %s1846_s22  ;;  %s97_s15 = int_to_ptr.vmem [resolvable:$true] %s96_s15 }
  0x57   :  { %p1850_p13 = scmp.lt.u32.totalorder %s1846_s22, %s2179_s11 }
  0x59   :  { %p1852_p0 = pnand %p1850_p13, %p1847_p12 }
  0x5b   :  { %1855 = shalt.err (!%p1852_p0)
}
  0x5c   :  { %s1856_s28 = scalar_lea.vmem %s97_s15, 512  ;;  %p1861_p2 = scmp.lt.s32.totalorder %s97_s15, %s97_s15 }
  0x5d   :  { %p1857_p1 = scmp.ne.s32.totalorder %s97_s15, %s1856_s28  ;;  %p1862_p3 = scmp.lt.s32.totalorder %s1856_s28, %s1856_s28 }
  0x5f   :  { %p1863_p4 = por %p1862_p3, %p1861_p2 }
  0x61   :  { %p1864_p5 = pnand %p1863_p4, %p1857_p1 }
  0x63   :  { %1867 = shalt.err (!%p1864_p5)
}
  0x64   :  { %s1908_s6 = smov 64   ;;  %s1909_s2 = smov 4  }
  0x65   :  { %102 = dma.hbm_to_vmem [thread:$0]  %s2179_s11, 512, %s97_s15, [#allocation12], %s1908_s6, %s1908_s6, %s1909_s2  }
  0x66   :  { %1890 = dma.done.wait [#allocation3], 128  }
  0x67   :  { %1891 = vsyncadd [#allocation3], 4294967168 }
  0x68   :  { %1892 = dma.done.wait [#allocation6], 8448  }
  0x69   :  { %1893 = vsyncadd [#allocation6], 4294958848 }
  0x6a   :  { %1894 = dma.done.wait [#allocation9], 4128  }
  0x6b   :  { %1895 = vsyncadd [#allocation9], 4294963168 }
  0x6c   :  { %1896 = dma.done.wait [#allocation12], 512  }
  0x6d   :  { %1897 = vsyncadd [#allocation12], 4294966784  ;;  %v1910_v0 = vmov 0   ;;  %vm225_vm0 = vcmask 1046528   ;;  %vm226_vm1 = vcmask 1047552   ;;  %v1911_v1 = vmov 65535  }
  0x6e   :  { %1560 = vset.pattern.permute.xlu0 %v1910_v0  ;;  %267 = vmatprep.mubr.bf16.mxu0 %v1910_v0  ;;  %v227_v2 = vsel %vm225_vm0, 4294967295, %v1911_v1  ;;  %v124_v3 = vld [vmem:[%s2168_s0] sm:$0xff]  ;;  %v209_v7 = vld [vmem:[#allocation2] sm:$0xff]  ;;  %vm221_vm2 = vcmask 121856   ;;  %vm1914_vm11 = vmmov 0   ;;  %vm1274_vm12 = vcmask 523264  }
  0x6f   :  { %v228_v4 = vsel %vm226_vm1, %v227_v2, 0  ;;  %131 = vperm.xlu0 %1560, %v124_v3   ;;  %v1561_v5 = vld [vmem:[#allocation7 + $0x4] ss:$8 sps:$4 sm:$0xff]   ;;  %v1563_v6 = vld [vmem:[#allocation7] ss:$8 sps:$4 sm:$0xff]   ;;  %v210_v13 = vpack.c.bf16 %v209_v7, %v209_v7  ;;  %s1915_s16 = smov [#allocation13]  }
  0x70   :  { %v1564_v8 = vld [vmem:[#allocation5 + $0x4] ss:$8 sps:$4 sm:$0xff]   ;;  %v233_v9 = vand.u32 %v1561_v5, %v228_v4  ;;  %v230_v10 = vand.u32 %v1563_v6, %v228_v4  ;;  %v1569_v12 = vld [vmem:[#allocation5] ss:$8 sps:$4 sm:$0xff]   ;;  %v1570_v14 = vld [vmem:[#allocation5 + $0x14] ss:$8 sps:$4 sm:$0xff]  }
  0x71   :  { %596 = vmatprep.subr.bf16.mxu1 %v1564_v8  ;;  %v1568_v11 = vld [vmem:[#allocation5 + $0x104] ss:$8 sps:$4 sm:$0xff]   ;;  %v1566_v15 = vld [vmem:[#allocation5 + $0x100] ss:$8 sps:$4 sm:$0xff]   ;;  %v1574_v16 = vld [vmem:[#allocation5 + $0x114] ss:$8 sps:$4 sm:$0xff]  }
  0x72   :  { %235 = vmatprep.subr.bf16.mxu0 %v233_v9  ;;  %597 = vmatpush1.bf16.msra.mxu1 %v1569_v12  ;;  %v1575_v17 = vld [vmem:[#allocation5 + $0x10] ss:$8 sps:$4 sm:$0xff]   ;;  %v1576_v18 = vld [vmem:[#allocation5 + $0x24] ss:$8 sps:$4 sm:$0xff]   ;;  %v1581_v21 = vld [vmem:[#allocation5 + $0x20] ss:$8 sps:$4 sm:$0xff]   ;;  %v125_v12 = vlaneseq }
  0x73   :  { %236 = vmatpush1.bf16.msra.mxu0 %v230_v10  ;;  %598 = vmatprep.subr.bf16.mxu1 %v1570_v14  ;;  %v1572_v19 = vld [vmem:[#allocation5 + $0x110] ss:$8 sps:$4 sm:$0xff]   ;;  %v1580_v20 = vld [vmem:[#allocation5 + $0x124] ss:$8 sps:$4 sm:$0xff]   ;;  %v1582_v22 = vld [vmem:[#allocation5 + $0x34] ss:$8 sps:$4 sm:$0xff]  }
  0x74   :  { %637 = vmatprep.subr.bf16.mxu0 %v1568_v11  ;;  %v1578_v23 = vld [vmem:[#allocation5 + $0x120] ss:$8 sps:$4 sm:$0xff]   ;;  %v1586_v24 = vld [vmem:[#allocation5 + $0x134] ss:$8 sps:$4 sm:$0xff]   ;;  %v1587_v25 = vld [vmem:[#allocation5 + $0x30] ss:$8 sps:$4 sm:$0xff]  }
  0x75   :  { %v1588_v26 = vld [vmem:[#allocation5 + $0x44] ss:$8 sps:$4 sm:$0xff]   ;;  %v1584_v27 = vld [vmem:[#allocation5 + $0x130] ss:$8 sps:$4 sm:$0xff]   ;;  %v1593_v29 = vld [vmem:[#allocation5 + $0x40] ss:$8 sps:$4 sm:$0xff]  }
  0x76   :  { %1339 = vmatmul.mubr.msk.bf16.vlgmr.msra.gmra.mrb[0].mxu0 %vm221_vm2, %v210_v13  ;;  %599 = vmatpush1.bf16.msra.mxu1 %v1575_v17  ;;  %v1592_v28 = vld [vmem:[#allocation5 + $0x144] ss:$8 sps:$4 sm:$0xff]   ;;  %v1594_v30 = vld [vmem:[#allocation5 + $0x54] ss:$8 sps:$4 sm:$0xff]   ;;  %v1590_v31 = vld [vmem:[#allocation5 + $0x140] ss:$8 sps:$4 sm:$0xff]  }
  0x77   :  { %638 = vmatpush1.bf16.msra.mxu0 %v1566_v15  ;;  %600 = vmatprep.subr.bf16.mxu1 %v1576_v18  ;;  %v1598_v32 = vld [vmem:[#allocation5 + $0x154] ss:$8 sps:$4 sm:$0xff]   ;;  %v1599_v33 = vld [vmem:[#allocation5 + $0x50] ss:$8 sps:$4 sm:$0xff]   ;;  %v1600_v34 = vld [vmem:[#allocation5 + $0x64] ss:$8 sps:$4 sm:$0xff]  }
  0x78   :  { %639 = vmatprep.subr.bf16.mxu0 %v1574_v16  ;;  %v1596_v35 = vld [vmem:[#allocation5 + $0x150] ss:$8 sps:$4 sm:$0xff]   ;;  %v1604_v36 = vld [vmem:[#allocation5 + $0x164] ss:$8 sps:$4 sm:$0xff]   ;;  %v1605_v37 = vld [vmem:[#allocation5 + $0x60] ss:$8 sps:$4 sm:$0xff]  }
  0x79   :  { %v1606_v38 = vld [vmem:[#allocation5 + $0x74] ss:$8 sps:$4 sm:$0xff]   ;;  %v1602_v39 = vld [vmem:[#allocation5 + $0x160] ss:$8 sps:$4 sm:$0xff]   ;;  %v1611_v41 = vld [vmem:[#allocation5 + $0x70] ss:$8 sps:$4 sm:$0xff]  }
  0x7a   :  { %601 = vmatpush1.bf16.msra.mxu1 %v1581_v21  ;;  %v1610_v40 = vld [vmem:[#allocation5 + $0x174] ss:$8 sps:$4 sm:$0xff]   ;;  %v1612_v42 = vld [vmem:[#allocation5 + $0x84] ss:$8 sps:$4 sm:$0xff]   ;;  %v1608_v43 = vld [vmem:[#allocation5 + $0x170] ss:$8 sps:$4 sm:$0xff]  }
  0x7b   :  { %640 = vmatpush1.bf16.msra.mxu0 %v1572_v19  ;;  %602 = vmatprep.subr.bf16.mxu1 %v1582_v22  ;;  %v1616_v44 = vld [vmem:[#allocation5 + $0x184] ss:$8 sps:$4 sm:$0xff]   ;;  %v1617_v45 = vld [vmem:[#allocation5 + $0x80] ss:$8 sps:$4 sm:$0xff]   ;;  %v1618_v46 = vld [vmem:[#allocation5 + $0x94] ss:$8 sps:$4 sm:$0xff]  }
  0x7c   :  { %641 = vmatprep.subr.bf16.mxu0 %v1580_v20  ;;  %v1614_v47 = vld [vmem:[#allocation5 + $0x180] ss:$8 sps:$4 sm:$0xff]   ;;  %v1622_v48 = vld [vmem:[#allocation5 + $0x194] ss:$8 sps:$4 sm:$0xff]   ;;  %v1623_v49 = vld [vmem:[#allocation5 + $0x90] ss:$8 sps:$4 sm:$0xff]  }
  0x7d   :  { %v1624_v50 = vld [vmem:[#allocation5 + $0xa4] ss:$8 sps:$4 sm:$0xff]   ;;  %v1620_v51 = vld [vmem:[#allocation5 + $0x190] ss:$8 sps:$4 sm:$0xff]   ;;  %v1629_v53 = vld [vmem:[#allocation5 + $0xa0] ss:$8 sps:$4 sm:$0xff]  }
  0x7e   :  { %603 = vmatpush1.bf16.msra.mxu1 %v1587_v25  ;;  %v1628_v52 = vld [vmem:[#allocation5 + $0x1a4] ss:$8 sps:$4 sm:$0xff]   ;;  %v1630_v54 = vld [vmem:[#allocation5 + $0xb4] ss:$8 sps:$4 sm:$0xff]   ;;  %v1626_v55 = vld [vmem:[#allocation5 + $0x1a0] ss:$8 sps:$4 sm:$0xff]  }
  0x7f   :  { %642 = vmatpush1.bf16.msra.mxu0 %v1578_v23  ;;  %604 = vmatprep.subr.bf16.mxu1 %v1588_v26  ;;  %v1635_v56 = vld [vmem:[#allocation5 + $0xb0] ss:$8 sps:$4 sm:$0xff]   ;;  %v1634_v57 = vld [vmem:[#allocation5 + $0x1b4] ss:$8 sps:$4 sm:$0xff]   ;;  %v1636_v58 = vld [vmem:[#allocation5 + $0xc4] ss:$8 sps:$4 sm:$0xff]  }
  0x80   :  { %643 = vmatprep.subr.bf16.mxu0 %v1586_v24  ;;  %v1632_v59 = vld [vmem:[#allocation5 + $0x1b0] ss:$8 sps:$4 sm:$0xff]   ;;  %v1641_v60 = vld [vmem:[#allocation5 + $0xc0] ss:$8 sps:$4 sm:$0xff]   ;;  %v1640_v61 = vld [vmem:[#allocation5 + $0x1c4] ss:$8 sps:$4 sm:$0xff]  }
  0x81   :  { %v1642_v62 = vld [vmem:[#allocation5 + $0xd4] ss:$8 sps:$4 sm:$0xff]   ;;  %v1638_v63 = vld [vmem:[#allocation5 + $0x1c0] ss:$8 sps:$4 sm:$0xff]   ;;  %v1647_v0 = vld [vmem:[#allocation5 + $0xd0] ss:$8 sps:$4 sm:$0xff]  }
  0x82   :  { %605 = vmatpush1.bf16.msra.mxu1 %v1593_v29  ;;  %v1646_v1 = vld [vmem:[#allocation5 + $0x1d4] ss:$8 sps:$4 sm:$0xff]   ;;  %v1648_v2 = vld [vmem:[#allocation5 + $0xe4] ss:$8 sps:$4 sm:$0xff]   ;;  %v1644_v3 = vld [vmem:[#allocation5 + $0x1d0] ss:$8 sps:$4 sm:$0xff]  }
  0x83   :  { %644 = vmatpush1.bf16.msra.mxu0 %v1584_v27  ;;  %606 = vmatprep.subr.bf16.mxu1 %v1594_v30  ;;  %v1653_v4 = vld [vmem:[#allocation5 + $0xe0] ss:$8 sps:$4 sm:$0xff]   ;;  %v1652_v5 = vld [vmem:[#allocation5 + $0x1e4] ss:$8 sps:$4 sm:$0xff]   ;;  %v1654_v6 = vld [vmem:[#allocation5 + $0xf4] ss:$8 sps:$4 sm:$0xff]  }
  0x84   :  { %645 = vmatprep.subr.bf16.mxu0 %v1592_v28  ;;  %v1650_v7 = vld [vmem:[#allocation5 + $0x1e0] ss:$8 sps:$4 sm:$0xff]   ;;  %v1659_v8 = vld [vmem:[#allocation5 + $0xf0] ss:$8 sps:$4 sm:$0xff]   ;;  %v1658_v9 = vld [vmem:[#allocation5 + $0x1f4] ss:$8 sps:$4 sm:$0xff]  }
  0x85   :  { %v1656_v10 = vld [vmem:[#allocation5 + $0x1f0] ss:$8 sps:$4 sm:$0xff]   ;;  %v1662_v11 = vld [vmem:[#allocation8 + $0x4] ss:$8 sps:$4 sm:$0xff]   ;;  %v126_v13 = vand.u32 127, %v125_v12  ;;  %s1325_s26 = sshll.u32 %s1915_s16, 4  ;;  %s1326_s26 = int_to_ptr.vmem [resolvable:$true] %s1325_s26 }
  0x86   :  { %607 = vmatpush1.bf16.msra.mxu1 %v1599_v33  ;;  %v1660_v18 = vld [vmem:[#allocation8] ss:$8 sps:$4 sm:$0xff]   ;;  %v1912_v19 = vmov 1.0|1.0   ;;  %v1665_v20 = vld [vmem:[#allocation8 + $0x14] ss:$8 sps:$4 sm:$0xff]   ;;  %p1873_p7 = scmp.lt.s32.totalorder %s1326_s26, %s1326_s26 }
  0x87   :  { %646 = vmatpush1.bf16.msra.mxu0 %v1590_v31  ;;  %608 = vmatprep.subr.bf16.mxu1 %v1600_v34  ;;  %v128_v14 = vadd.s32 256, %v126_v13  ;;  %v129_v15 = vadd.s32 384, %v126_v13  ;;  %v127_v16 = vadd.s32 128, %v126_v13  ;;  %v1663_v21 = vld [vmem:[#allocation8 + $0x10] ss:$8 sps:$4 sm:$0xff]  }
  0x88   :  { %647 = vmatprep.subr.bf16.mxu0 %v1598_v32  ;;  %v1668_v22 = vld [vmem:[#allocation8 + $0x24] ss:$8 sps:$4 sm:$0xff]   ;;  %v1666_v23 = vld [vmem:[#allocation8 + $0x20] ss:$8 sps:$4 sm:$0xff]   ;;  %v1671_v24 = vld [vmem:[#allocation8 + $0x34] ss:$8 sps:$4 sm:$0xff]  }
  0x89   :  { %v1669_v25 = vld [vmem:[#allocation8 + $0x30] ss:$8 sps:$4 sm:$0xff]   ;;  %v1674_v26 = vld [vmem:[#allocation8 + $0x44] ss:$8 sps:$4 sm:$0xff]   ;;  %v1672_v27 = vld [vmem:[#allocation8 + $0x40] ss:$8 sps:$4 sm:$0xff]  }
  0x8a   :  { %609 = vmatpush1.bf16.msra.mxu1 %v1605_v37  ;;  %v1677_v28 = vld [vmem:[#allocation8 + $0x54] ss:$8 sps:$4 sm:$0xff]   ;;  %v1675_v29 = vld [vmem:[#allocation8 + $0x50] ss:$8 sps:$4 sm:$0xff]   ;;  %v1680_v30 = vld [vmem:[#allocation8 + $0x64] ss:$8 sps:$4 sm:$0xff]  }
  0x8b   :  { %648 = vmatpush1.bf16.msra.mxu0 %v1596_v35  ;;  %610 = vmatprep.subr.bf16.mxu1 %v1606_v38  ;;  %v1678_v31 = vld [vmem:[#allocation8 + $0x60] ss:$8 sps:$4 sm:$0xff]   ;;  %v1683_v32 = vld [vmem:[#allocation8 + $0x74] ss:$8 sps:$4 sm:$0xff]   ;;  %v1681_v33 = vld [vmem:[#allocation8 + $0x70] ss:$8 sps:$4 sm:$0xff]  }
  0x8c   :  { %649 = vmatprep.subr.bf16.mxu0 %v1604_v36  ;;  %v1686_v34 = vld [vmem:[#allocation8 + $0x84] ss:$8 sps:$4 sm:$0xff]   ;;  %v1684_v35 = vld [vmem:[#allocation8 + $0x80] ss:$8 sps:$4 sm:$0xff]   ;;  %v1689_v36 = vld [vmem:[#allocation8 + $0x94] ss:$8 sps:$4 sm:$0xff]  }
  0x8d   :  { %v1687_v37 = vld [vmem:[#allocation8 + $0x90] ss:$8 sps:$4 sm:$0xff]   ;;  %v1692_v38 = vld [vmem:[#allocation8 + $0xa4] ss:$8 sps:$4 sm:$0xff]  }
  0x8e   :  { %611 = vmatpush1.bf16.msra.mxu1 %v1611_v41  ;;  %v1693_v41 = vld [vmem:[#allocation8 + $0xb0] ss:$8 sps:$4 sm:$0xff]  }
  0x8f   :  { %650 = vmatpush1.bf16.msra.mxu0 %v1602_v39  ;;  %612 = vmatprep.subr.bf16.mxu1 %v1612_v42  ;;  %v1690_v39 = vld [vmem:[#allocation8 + $0xa0] ss:$8 sps:$4 sm:$0xff]   ;;  %v1698_v42 = vld [vmem:[#allocation8 + $0xc4] ss:$8 sps:$4 sm:$0xff]  }
  0x90   :  { %651 = vmatprep.subr.bf16.mxu0 %v1610_v40  ;;  %v1695_v40 = vld [vmem:[#allocation8 + $0xb4] ss:$8 sps:$4 sm:$0xff]  }
  0x92   :  { %613 = vmatpush1.bf16.msra.mxu1 %v1617_v45  ;;  %v1699_v45 = vld [vmem:[#allocation8 + $0xd0] ss:$8 sps:$4 sm:$0xff]  }
  0x93   :  { %652 = vmatpush1.bf16.msra.mxu0 %v1608_v43  ;;  %614 = vmatprep.subr.bf16.mxu1 %v1618_v46  ;;  %v1696_v43 = vld [vmem:[#allocation8 + $0xc0] ss:$8 sps:$4 sm:$0xff]  }
  0x94   :  { %653 = vmatprep.subr.bf16.mxu0 %v1616_v44  ;;  %v1701_v44 = vld [vmem:[#allocation8 + $0xd4] ss:$8 sps:$4 sm:$0xff]  }
  0x96   :  { %615 = vmatpush1.bf16.msra.mxu1 %v1623_v49 }
  0x97   :  { %654 = vmatpush1.bf16.msra.mxu0 %v1614_v47  ;;  %616 = vmatprep.subr.bf16.mxu1 %v1624_v50  ;;  %v1702_v50 = vld [vmem:[#allocation8 + $0xe0] ss:$8 sps:$4 sm:$0xff]  }
  0x98   :  { %655 = vmatprep.subr.bf16.mxu0 %v1622_v48  ;;  %v1704_v48 = vld [vmem:[#allocation8 + $0xe4] ss:$8 sps:$4 sm:$0xff]  }
  0x9a   :  { %617 = vmatpush1.bf16.msra.mxu1 %v1629_v53  ;;  %v1705_v53 = vld [vmem:[#allocation8 + $0xf0] ss:$8 sps:$4 sm:$0xff]  }
  0x9b   :  { %656 = vmatpush1.bf16.msra.mxu0 %v1620_v51  ;;  %618 = vmatprep.subr.bf16.mxu1 %v1630_v54  ;;  %v1708_v54 = vld [vmem:[%s2175_s7 + $0x40] sm:$0xff]  }
  0x9c   :  { %657 = vmatprep.subr.bf16.mxu0 %v1628_v52  ;;  %v1707_v52 = vld [vmem:[#allocation8 + $0xf4] ss:$8 sps:$4 sm:$0xff]  }
  0x9e   :  { %619 = vmatpush1.bf16.msra.mxu1 %v1635_v56  ;;  %v1710_v56 = vld [vmem:[%s2175_s7 + $0x48] sm:$0xff]  }
  0x9f   :  { %658 = vmatpush1.bf16.msra.mxu0 %v1626_v55  ;;  %620 = vmatprep.subr.bf16.mxu1 %v1636_v58  ;;  %v1709_v55 = vld [vmem:[%s2175_s7] sm:$0xff]   ;;  %v1712_v58 = vld [vmem:[%s2175_s7 + $0x50] sm:$0xff]  }
  0xa0   :  { %659 = vmatprep.subr.bf16.mxu0 %v1634_v57  ;;  %v1711_v57 = vld [vmem:[%s2175_s7 + $0x8] sm:$0xff]  }
  0xa2   :  { %621 = vmatpush1.bf16.msra.mxu1 %v1641_v60  ;;  %v1714_v60 = vld [vmem:[%s2175_s7 + $0x58] sm:$0xff]  }
  0xa3   :  { %660 = vmatpush1.bf16.msra.mxu0 %v1632_v59  ;;  %622 = vmatprep.subr.bf16.mxu1 %v1642_v62  ;;  %v1713_v59 = vld [vmem:[%s2175_s7 + $0x10] sm:$0xff]   ;;  %v1716_v62 = vld [vmem:[%s2175_s7 + $0x60] sm:$0xff]  }
  0xa4   :  { %661 = vmatprep.subr.bf16.mxu0 %v1640_v61  ;;  %v1715_v61 = vld [vmem:[%s2175_s7 + $0x18] sm:$0xff]  }
  0xa6   :  { %623 = vmatpush1.bf16.msra.mxu1 %v1647_v0  ;;  %v1718_v0 = vld [vmem:[%s2175_s7 + $0x68] sm:$0xff]  }
  0xa7   :  { %662 = vmatpush1.bf16.msra.mxu0 %v1638_v63  ;;  %624 = vmatprep.subr.bf16.mxu1 %v1648_v2  ;;  %v1717_v63 = vld [vmem:[%s2175_s7 + $0x20] sm:$0xff]   ;;  %v681_v2 = vshrl.u32 %v125_v12, 7 }
  0xa8   :  { %663 = vmatprep.subr.bf16.mxu0 %v1646_v1  ;;  %v1719_v1 = vld [vmem:[%s2175_s7 + $0x28] sm:$0xff]  }
  0xaa   :  { %625 = vmatpush1.bf16.msra.mxu1 %v1653_v4  ;;  %v678_v4 = vld [vmem:[%s2172_s4] sm:$0x3] }
  0xab   :  { %664 = vmatpush1.bf16.msra.mxu0 %v1644_v3  ;;  %626 = vmatprep.subr.bf16.mxu1 %v1654_v6  ;;  %v682_v3 = vsub.s32 0, %v681_v2 }
  0xac   :  { %665 = vmatprep.subr.bf16.mxu0 %v1652_v5  ;;  %v686_v5 = vsub.s32 1, %v681_v2 }
  0xae   :  { %627 = vmatpush1.bf16.msra.mxu1 %v1659_v8 }
  0xaf   :  { %666 = vmatpush1.bf16.msra.mxu0 %v1650_v7  ;;  %900 = vmatprep.subr.bf16.mxu1 %v1662_v11 }
  0xb0   :  { %667 = vmatprep.subr.bf16.mxu0 %v1658_v9  ;;  %v683_v9 = vrot.slane %v678_v4, %v682_v3 }
  0xb3   :  { %668 = vmatpush1.bf16.msra.mxu0 %v1656_v10 }
  0xb4   :  { %1476 = vmatprep.subr.bf16.mxu0 %v1708_v54 }
  0xee   :  { %v132_v17 = vpop.permute.xlu0 %131 }
  0xef   :  { %vm135_vm3 = vcmp.eq.s32.totalorder %v128_v14, %v132_v17  ;;  %vm136_vm4 = vcmp.eq.s32.totalorder %v129_v15, %v132_v17  ;;  %vm134_vm5 = vcmp.eq.s32.totalorder %v127_v16, %v132_v17  ;;  %vm133_vm6 = vcmp.eq.s32.totalorder %v126_v13, %v132_v17 }
  0xf0   :  { %vm1410_vm7 = vmpackc.low %vm135_vm3, %vm135_vm3  ;;  %v687_v14 = vrot.slane %v678_v4, %v686_v5 }
  0xf1   :  { %vm1404_vm8 = vmpackc.low %vm134_vm5, %vm134_vm5 }
  0xf2   :  { %1405 = vmatprep.mubr.msk.bf16.mxu1 %vm1404_vm8, %v1912_v19  ;;  %vm1408_vm9 = vmpackc.low %vm136_vm4, %vm136_vm4 }
  0xf3   :  { %1409 = vmatprep.mubr.msk.bf16.mxu0 %vm1408_vm9, %v1912_v19  ;;  %vm1406_vm10 = vmpackc.low %vm133_vm6, %vm133_vm6 }
  0xf4   :  { %1407 = vmatmul.mubr.msk.bf16.vlgmr.msra.gmra.mrb[0].mxu1 %vm1406_vm10, %v1912_v19  ;;  %1411 = vmatmul.mubr.msk.bf16.vlgmr.msra.gmra.mrb[4].mxu0 %vm1410_vm7, %v1912_v19 }
  0xf5   :  { %901 = vmatpush1.bf16.msra.mxu1 %v1660_v18  ;;  %1477 = vmatpush3.bf16.msra.mxu0 %v1709_v55  ;;  %v1444_v55 = vld [vmem:[%s2176_s8] ss:$0 sm:$0xff] }
  0xf6   :  { %902 = vmatprep.subr.bf16.mxu1 %v1665_v20  ;;  %1478 = vmatprep.subr.bf16.mxu0 %v1710_v56 }
  0xf9   :  { %903 = vmatpush1.bf16.msra.mxu1 %v1663_v21  ;;  %1479 = vmatpush3.bf16.msra.mxu0 %v1711_v57 }
  0xfa   :  { %904 = vmatprep.subr.bf16.mxu1 %v1668_v22  ;;  %1480 = vmatprep.subr.bf16.mxu0 %v1712_v58 }
  0xfd   :  { %905 = vmatpush1.bf16.msra.mxu1 %v1666_v23  ;;  %1481 = vmatpush3.bf16.msra.mxu0 %v1713_v59 }
  0xfe   :  { %906 = vmatprep.subr.bf16.mxu1 %v1671_v24  ;;  %1482 = vmatprep.subr.bf16.mxu0 %v1714_v60 }
 0x101   :  { %907 = vmatpush1.bf16.msra.mxu1 %v1669_v25  ;;  %1483 = vmatpush3.bf16.msra.mxu0 %v1715_v61 }
 0x102   :  { %908 = vmatprep.subr.bf16.mxu1 %v1674_v26  ;;  %1484 = vmatprep.subr.bf16.mxu0 %v1716_v62  ;;  %v1720_v26 = vld [vmem:[%s2175_s7 + $0x70] sm:$0xff]  }
 0x105   :  { %909 = vmatpush1.bf16.msra.mxu1 %v1672_v27  ;;  %1485 = vmatpush3.bf16.msra.mxu0 %v1717_v63  ;;  %v1721_v27 = vld [vmem:[%s2175_s7 + $0x30] sm:$0xff]   ;;  %v1734_v63 = vld [vmem:[#allocation11 + $0x10] sm:$0xff]  }
 0x106   :  { %910 = vmatprep.subr.bf16.mxu1 %v1677_v28  ;;  %1486 = vmatprep.subr.bf16.mxu0 %v1718_v0  ;;  %v1722_v28 = vld [vmem:[%s2175_s7 + $0x78] sm:$0xff]   ;;  %v1735_v0 = vld [vmem:[#allocation11 + $0x18] sm:$0xff]  }
 0x109   :  { %911 = vmatpush1.bf16.msra.mxu1 %v1675_v29  ;;  %1487 = vmatpush3.bf16.msra.mxu0 %v1719_v1  ;;  %v1723_v29 = vld [vmem:[%s2175_s7 + $0x38] sm:$0xff]   ;;  %v1461_v1 = vld [vmem:[%s2178_s10] ss:$0 sm:$0xff]  ;;  %s1868_s10 = scalar_lea.vmem %s1326_s26, 128 }
 0x10a   :  { %912 = vmatprep.subr.bf16.mxu1 %v1680_v30  ;;  %1488 = vmatprep.subr.bf16.mxu0 %v1720_v26  ;;  %v1913_v30 = vmov 0.0   ;;  %p1869_p6 = scmp.ne.s32.totalorder %s1326_s26, %s1868_s10  ;;  %p1874_p8 = scmp.lt.s32.totalorder %s1868_s10, %s1868_s10 }
 0x10c   :  { %p1875_p9 = por %p1874_p8, %p1873_p7 }
 0x10d   :  { %913 = vmatpush1.bf16.msra.mxu1 %v1678_v31  ;;  %1489 = vmatpush3.bf16.msra.mxu0 %v1721_v27  ;;  %v728_v31 = vld [vmem:[#allocation10] sm:$0x3] }
 0x10e   :  { %914 = vmatprep.subr.bf16.mxu1 %v1683_v32  ;;  %1490 = vmatprep.subr.bf16.mxu0 %v1722_v28  ;;  %v733_v32 = vrot.slane %v728_v31, %v682_v3  ;;  %p1876_p10 = pnand %p1875_p9, %p1869_p6 }
 0x111   :  { %915 = vmatpush1.bf16.msra.mxu1 %v1681_v33  ;;  %1491 = vmatpush3.bf16.msra.mxu0 %v1723_v29  ;;  %v737_v33 = vrot.slane %v728_v31, %v686_v5 }
 0x112   :  { %916 = vmatprep.subr.bf16.mxu1 %v1686_v34  ;;  %1512 = vmatprep.subr.bf16.mxu0 %v1913_v30 }
 0x115   :  { %917 = vmatpush1.bf16.msra.mxu1 %v1684_v35 }
 0x116   :  { %918 = vmatprep.subr.bf16.mxu1 %v1689_v36 }
 0x119   :  { %919 = vmatpush1.bf16.msra.mxu1 %v1687_v37 }
 0x11a   :  { %920 = vmatprep.subr.bf16.mxu1 %v1692_v38 }
 0x11d   :  { %921 = vmatpush1.bf16.msra.mxu1 %v1690_v39 }
 0x11e   :  { %922 = vmatprep.subr.bf16.mxu1 %v1695_v40 }
 0x121   :  { %923 = vmatpush1.bf16.msra.mxu1 %v1693_v41 }
 0x122   :  { %924 = vmatprep.subr.bf16.mxu1 %v1698_v42 }
 0x125   :  { %925 = vmatpush1.bf16.msra.mxu1 %v1696_v43  ;;  %v1724_v43 = vld [vmem:[%s2177_s9] sm:$0xff]  }
 0x126   :  { %926 = vmatprep.subr.bf16.mxu1 %v1701_v44 }
 0x129   :  { %927 = vmatpush1.bf16.msra.mxu1 %v1699_v45  ;;  %v1725_v45 = vld [vmem:[%s2177_s9 + $0x8] sm:$0xff]  }
 0x12a   :  { %928 = vmatprep.subr.bf16.mxu1 %v1704_v48  ;;  %v1728_v48 = vld [vmem:[%s2177_s9 + $0x20] sm:$0xff]  }
 0x12d   :  { %929 = vmatpush1.bf16.msra.mxu1 %v1702_v50  ;;  %v1730_v50 = vld [vmem:[%s2177_s9 + $0x30] sm:$0xff]  }
 0x12e   :  { %930 = vmatprep.subr.bf16.mxu1 %v1707_v52  ;;  %v1732_v52 = vld [vmem:[#allocation11] sm:$0xff]  }
 0x131   :  { %931 = vmatpush1.bf16.msra.mxu1 %v1705_v53  ;;  %v1733_v53 = vld [vmem:[#allocation11 + $0x8] sm:$0xff]  }
 0x132   :  { %1532 = vmatprep.subr.bf16.mxu1 %v1913_v30 }
 0x149   :  { %v269_v46 = vpop.f32.mrb[0].mxu0 }
 0x14a   :  { %v271_v47 = vpop.f32.mrb[1].mxu0 }
 0x14b   :  { %v273_v49 = vpop.f32.mrb[2].mxu0 }
 0x14c   :  { %v274_v51 = vpop.f32.mrb[3].mxu0  ;;  %v1729_v49 = vld [vmem:[%s2177_s9 + $0x28] sm:$0xff]  }
 0x14d   :  { %v1731_v51 = vld [vmem:[%s2177_s9 + $0x38] sm:$0xff]  }
 0x1c7   :  { %v630_v6 = vpop.f32.mrb[0].mxu1  ;;  %v671_v7 = vpop.f32.mrb[4].mxu0 }
 0x1c8   :  { %v631_v8 = vadd.f32 %v630_v6, %v269_v46  ;;  %v632_v10 = vpop.f32.mrb[1].mxu1  ;;  %v673_v11 = vpop.f32.mrb[5].mxu0  ;;  %v1726_v46 = vld [vmem:[%s2177_s9 + $0x10] sm:$0xff]  }
 0x1c9   :  { %v633_v13 = vadd.f32 %v632_v10, %v271_v47  ;;  %v634_v15 = vpop.f32.mrb[2].mxu1  ;;  %v675_v16 = vpop.f32.mrb[6].mxu0  ;;  %v1727_v47 = vld [vmem:[%s2177_s9 + $0x18] sm:$0xff]  }
 0x1ca   :  { %v672_v17 = vadd.f32 %v671_v7, %v631_v8  ;;  %v635_v18 = vpop.f32.mrb[3].mxu1  ;;  %v676_v19 = vpop.f32.mrb[7].mxu0 }
 0x1cb   :  { %v674_v12 = vadd.f32 %v673_v11, %v633_v13 }
 0x1cc   :  { %v690_v20 = vadd.f32 %v683_v9, %v672_v17  ;;  %v1470_v9 = vld [vmem:[%s2180_s12] ss:$0 sm:$0xff] }
 0x1cd   :  { %v691_v21 = vadd.f32 %v687_v14, %v674_v12 }
 0x1ce   :  { %v692_v22 = vmax.f32 %v690_v20, 0.0 }
 0x1cf   :  { %v693_v23 = vmax.f32 %v691_v21, 0.0 }
 0x1d0   :  { %v694_v25 = vpack.c.bf16 %v692_v22, %v692_v22 }
 0x1d1   :  { %v695_v24 = vpack.c.bf16 %v693_v23, %v693_v23 }
 0x1d3   :  { %932 = vmatprep.mubr.bf16.mxu1 %v695_v24 }
 0x1d4   :  { %933 = vmatmul.mubr.bf16.vlgmr.msra.gmra.mrb[4].mxu1 %v694_v25 }
 0x1d5   :  { %1540 = vmatprep.mubr.msk.bf16.mxu1 %vm1914_vm11, %v1913_v30  ;;  %1533 = vmatpush3.bf16.msra.mxu1 %v1732_v52 }
 0x1d6   :  { %1534 = vmatprep.subr.bf16.mxu1 %v1913_v30 }
 0x1d9   :  { %1535 = vmatpush3.bf16.msra.mxu1 %v1733_v53 }
 0x1da   :  { %1536 = vmatprep.subr.bf16.mxu1 %v1913_v30 }
 0x1dd   :  { %1537 = vmatpush3.bf16.msra.mxu1 %v1734_v63 }
 0x1de   :  { %1538 = vmatprep.subr.bf16.mxu1 %v1913_v30 }
 0x1e1   :  { %1539 = vmatpush3.bf16.msra.mxu1 %v1735_v0 }
 0x2a7   :  { %v934_v34 = vpop.f32.mrb[4].mxu1 }
 0x2a8   :  { %v935_v35 = vadd.f32 %v934_v34, %v733_v32  ;;  %v936_v36 = vpop.f32.mrb[5].mxu1 }
 0x2a9   :  { %v937_v37 = vadd.f32 %v936_v36, %v737_v33  ;;  %v938_v38 = vpop.f32.mrb[6].mxu1 }
 0x2aa   :  { %v941_v39 = vmax.f32 %v935_v35, 0.0  ;;  %v939_v40 = vpop.f32.mrb[7].mxu1 }
 0x2ab   :  { %v942_v41 = vmax.f32 %v937_v37, 0.0 }
 0x2ac   :  { %v943_v44 = vpack.c.bf16 %v941_v39, %v941_v39 }
 0x2ad   :  { %v944_v42 = vpack.c.bf16 %v942_v41, %v942_v41 }
 0x2af   :  { %1112 = vmatprep.mubr.bf16.mxu0 %v944_v42 }
 0x2b0   :  { %1113 = vmatmul.mubr.bf16.vlgmr.msra.gmra.mrb[8].mxu0 %v943_v44 }
 0x2b1   :  { %1513 = vmatpush3.bf16.msra.mxu0 %v1724_v43  ;;  %1528 = vmatprep.mubr.msk.bf16.mxu0 %vm1914_vm11, %v1913_v30 }
 0x2b2   :  { %1514 = vmatprep.subr.bf16.mxu0 %v1913_v30 }
 0x2b5   :  { %1515 = vmatpush3.bf16.msra.mxu0 %v1725_v45 }
 0x2b6   :  { %1516 = vmatprep.subr.bf16.mxu0 %v1913_v30 }
 0x2b9   :  { %1517 = vmatpush3.bf16.msra.mxu0 %v1726_v46 }
 0x2ba   :  { %1518 = vmatprep.subr.bf16.mxu0 %v1913_v30 }
 0x2bd   :  { %1519 = vmatpush3.bf16.msra.mxu0 %v1727_v47 }
 0x2be   :  { %1520 = vmatprep.subr.bf16.mxu0 %v1913_v30 }
 0x2c1   :  { %1521 = vmatpush3.bf16.msra.mxu0 %v1728_v48 }
 0x2c2   :  { %1522 = vmatprep.subr.bf16.mxu0 %v1913_v30 }
 0x2c5   :  { %1523 = vmatpush3.bf16.msra.mxu0 %v1729_v49 }
 0x2c6   :  { %1524 = vmatprep.subr.bf16.mxu0 %v1913_v30 }
 0x2c9   :  { %1525 = vmatpush3.bf16.msra.mxu0 %v1730_v50 }
 0x2ca   :  { %1526 = vmatprep.subr.bf16.mxu0 %v1913_v30 }
 0x2cd   :  { %1527 = vmatpush3.bf16.msra.mxu0 %v1731_v51 }
 0x383   :  { %v1492_v54 = vpop.f32.mrb[8].mxu0 }
 0x384   :  { %v1493_v56 = vpop.f32.mrb[9].mxu0 }
 0x385   :  { %v1494_v57 = vadd.f32 %v1493_v56, %v1492_v54  ;;  %v1495_v58 = vpop.f32.mrb[10].mxu0 }
 0x386   :  { %v1496_v59 = vpop.f32.mrb[11].mxu0 }
 0x387   :  { %v1115_v60 = vadd.f32 %v1494_v57, %v1444_v55 }
 0x389   :  { %v1120_v61 = vmax.f32 %v1115_v60, 0.0 }
 0x38b   :  { %v1121_v62 = vpack.c.bf16 %v1120_v61, %v1120_v61 }
 0x38d   :  { %1529 = vmatmul.mubr.bf16.vlgmr.msra.gmra.mrb[12].mxu0 %v1121_v62 }
 0x460   :  { %v1227_v2 = vpop.f32.mrb[12].mxu0 }
 0x461   :  { %v1228_v3 = vadd.f32 %v1461_v1, %v1227_v2  ;;  %v1530_v4 = vpop.f32.mrb[13].mxu0 }
 0x462   :  { %v1230_v5 = vpop.f32.mrb[14].mxu0 }
 0x463   :  { %v1233_v6 = vmax.f32 %v1228_v3, 0.0  ;;  %v1531_v7 = vpop.f32.mrb[15].mxu0 }
 0x465   :  { %v1234_v8 = vpack.c.bf16 %v1233_v6, %v1233_v6 }
 0x467   :  { %1541 = vmatmul.mubr.msk.bf16.vlgmr.msra.gmra.mrb[8].mxu1 %vm1274_vm12, %v1234_v8 }
 0x53a   :  { %v1312_v10 = vpop.f32.mrb[8].mxu1 }
 0x53b   :  { %v1313_v11 = vadd.f32 %v1470_v9, %v1312_v10  ;;  %v1542_v13 = vpop.f32.mrb[9].mxu1 }
 0x53c   :  { %v1315_v14 = vpop.f32.mrb[10].mxu1 }
 0x53d   :  { %1318 = vst [vmem:[#allocation13] sm:$0xff] %v1313_v11  ;;  %v1543_v15 = vpop.f32.mrb[11].mxu1 }
 0x53e   :  { %1879 = shalt.err (!%p1876_p10)
}
 0x53f   :  { %s1880_s12 = scalar_lea.hbm %s2181_s13, 128 }
 0x540   :  { %p1881_p11 = scmp.ne.s32.totalorder %s2181_s13, %s1880_s12  ;;  %p1884_p12 = scmp.lt.u32.totalorder %s1880_s12, %s2181_s13 }
 0x542   :  { %p1886_p13 = pnand %p1884_p12, %p1881_p11 }
 0x544   :  { %1889 = shalt.err (!%p1886_p13)
}
 0x545   :  { %1328 = dma.vmem_to_hbm [thread:$0]  %s1326_s26, 128, %s2181_s13, [#allocation4]  }
 0x546   :  { %1898 = dma.done.wait [#allocation4], 128  }
 0x547   :  { %1899 = vsyncadd [#allocation4], 4294967168 }
 0x548   :  { %1332 = vsyncpa [#allocation3], 1 }
 0x549   :  { %1333 = vsyncpa [#allocation6], 1 }
 0x54a   :  { %1334 = vsyncpa [#allocation9], 1 }
 0x54b   :  { %1335 = vsyncpa [#allocation12], 1 }
 0x54c   :  { %1336 = vsyncpa [#allocation4], 1 }

</bundles_post_ra>
